<compile_context>
chip_gen: v7x
topology: tpu7x:2x2x1
jax: 0.10.0
libtpu: 0.0.40
codegen_flags: <defaults>
</compile_context>

<pallas_src>
import jax
import jax.numpy as jnp
from jax.experimental import pallas as pl
from jax.experimental.pallas import tpu as pltpu


def _round_up(n, m):
    return ((n + m - 1) // m) * m


def _elu(x):
    # ELU with alpha=1, numerically safe (clamp exp argument).
    return jnp.where(x > 0, x, jnp.exp(jnp.minimum(x, 0.0)) - 1.0)


def _make_kernel(cin, cin_pad):
    """Build the kernel body with static channel sizes baked in."""

    def kernel(x_ref, w1_ref, b1_ref, w2a_ref, b2a_ref, w2b_ref, b2b_ref,
               o_ref, xp_ref):
        # x_ref / o_ref: (cin, T)  -- channels on sublanes, pixels on lanes.
        # xp_ref scratch: (cin_pad, T) -- 8-aligned staging buffer for the MXU.
        x = x_ref[...].astype(jnp.float32)

        if cin_pad == cin:
            xp = x
        else:
            # Stage x into a zero-padded VMEM scratch so the matmul contraction
            # dim is a multiple of 8 without any HBM-side padding copies.
            xp_ref[...] = jnp.zeros(xp_ref.shape, jnp.float32)
            xp_ref[pl.ds(0, cin), :] = x
            xp = xp_ref[...]

        h = _elu(xp)
        # conv1 (1x1): (Chid_pad, Cin_pad) @ (Cin_pad, T) -> (Chid_pad, T)
        h = jnp.dot(w1_ref[...], h, preferred_element_type=jnp.float32)
        h = h + b1_ref[...]
        h = _elu(h)
        # TODO(synk): nn.Dropout(0.1) is identity here (eval-mode semantics).

        # conv2 (1x1) with pre-split GLU halves: two (Cin_pad, Chid_pad) matmuls.
        a = jnp.dot(w2a_ref[...], h, preferred_element_type=jnp.float32) + b2a_ref[...]
        g = jnp.dot(w2b_ref[...], h, preferred_element_type=jnp.float32) + b2b_ref[...]

        # GLU + residual on the valid channels only; store lane-dense.
        a = a[:cin, :]
        g = g[:cin, :]
        o_ref[...] = (a * jax.nn.sigmoid(g) + x).astype(o_ref.dtype)

    return kernel


def residual_block2d_pallas(x_nchw, params, *, tile_hw=2048):
    """Forward of ResidualBlock2d (kernel_size=1, causal=False).

    x_nchw: (B, Cin, H, W) float32.  params: PyTorch-layout 1x1-conv weights
      w1 (Chid, Cin), b1 (Chid,), w2 (2*Cin, Chid), b2 (2*Cin,).
    Returns (B, Cin, H, W).
    """
    w1, b1, w2, b2 = params
    chid, cin = w1.shape
    assert w2.shape == (2 * cin, chid)
    B, C, H, W = x_nchw.shape
    assert C == cin

    f32 = jnp.float32
    cin_pad = _round_up(cin, 8)
    chid_pad = _round_up(chid, 8)

    # --- weights: zero-pad channel dims once (tiny, does not change math) ---
    w1p = jnp.zeros((chid_pad, cin_pad), f32).at[:chid, :cin].set(w1)
    b1p = jnp.zeros((chid_pad, 1), f32).at[:chid, 0].set(b1)

    w2a, w2b = w2[:cin], w2[cin:]
    b2a, b2b = b2[:cin], b2[cin:]
    w2ap = jnp.zeros((cin_pad, chid_pad), f32).at[:cin, :chid].set(w2a)
    w2bp = jnp.zeros((cin_pad, chid_pad), f32).at[:cin, :chid].set(w2b)
    b2ap = jnp.zeros((cin_pad, 1), f32).at[:cin, 0].set(b2a)
    b2bp = jnp.zeros((cin_pad, 1), f32).at[:cin, 0].set(b2b)

    # --- pixel axis: channels-first, pixels on lanes --------------------------
    HW = H * W
    tile = max(128, min(_round_up(tile_hw, 128), _round_up(HW, 128)))
    hw_pad = _round_up(HW, tile)

    x3 = x_nchw.reshape(B, cin, HW)          # no transpose, no channel padding
    if hw_pad != HW:
        x3 = jnp.pad(x3, ((0, 0), (0, 0), (0, hw_pad - HW)))

    grid = (B, hw_pad // tile)

    def const(arr):
        return pl.BlockSpec(arr.shape, lambda b, m: (0, 0))

    out = pl.pallas_call(
        _make_kernel(cin, cin_pad),
        out_shape=jax.ShapeDtypeStruct((B, cin, hw_pad), x_nchw.dtype),
        grid_spec=pltpu.PrefetchScalarGridSpec(
            num_scalar_prefetch=0,
            grid=grid,
            in_specs=[
                pl.BlockSpec((None, cin, tile), lambda b, m: (b, 0, m)),  # x
                const(w1p),    # (Chid_pad, Cin_pad)
                const(b1p),    # (Chid_pad, 1)
                const(w2ap),   # (Cin_pad, Chid_pad)
                const(b2ap),   # (Cin_pad, 1)
                const(w2bp),   # (Cin_pad, Chid_pad)
                const(b2bp),   # (Cin_pad, 1)
            ],
            out_specs=pl.BlockSpec((None, cin, tile), lambda b, m: (b, 0, m)),
            scratch_shapes=[pltpu.VMEM((cin_pad, tile), jnp.float32)],
        ),
        compiler_params=pltpu.CompilerParams(
            dimension_semantics=("parallel", "parallel")),
    )(x3, w1p, b1p, w2ap, b2ap, w2bp, b2bp)

    if hw_pad != HW:
        out = out[:, :, :HW]
    return out.reshape(B, cin, H, W)


def residual_block2d_reference(x_nchw, params):
    """Pure-JAX reference implementing the PyTorch forward semantics."""
    w1, b1, w2, b2 = params
    B, C, H, W = x_nchw.shape
    x = x_nchw.reshape(B, C, H * W).astype(jnp.float32)
    h = _elu(x)
    h = jnp.einsum("oc,bcm->bom", w1, h) + b1[None, :, None]
    h = _elu(h)
    h = jnp.einsum("oc,bcm->bom", w2, h) + b2[None, :, None]
    a, g = h[:, :C], h[:, C:]
    y = a * jax.nn.sigmoid(g) + x
    return y.reshape(B, C, H, W).astype(x_nchw.dtype)


def init_params(key, in_channels, hidden_channels):
    """Deterministic synthetic 1x1-conv parameters (PyTorch (Cout, Cin) layout).

    weight_norm only reparametrizes the weights; plain weights give an
    identical forward pass.
    """
    ks = jax.random.split(key, 4)
    scale = 0.1
    w1 = scale * jax.random.normal(ks[0], (hidden_channels, in_channels), jnp.float32)
    b1 = scale * jax.random.normal(ks[1], (hidden_channels,), jnp.float32)
    w2 = scale * jax.random.normal(ks[2], (2 * in_channels, hidden_channels), jnp.float32)
    b2 = scale * jax.random.normal(ks[3], (2 * in_channels,), jnp.float32)
    return (w1, b1, w2, b2)


if __name__ == "__main__":
    # Small shapes consistent with the module's forward (PostNet usage).
    B, Cin, H, W = 2, 4, 16, 16
    Chid = 32

    key = jax.random.PRNGKey(0)
    kx, kp = jax.random.split(key)
    x = jax.random.normal(kx, (B, Cin, H, W), jnp.float32)
    params = init_params(kp, Cin, Chid)

    out = residual_block2d_pallas(x, params)
    out = jax.block_until_ready(out)

    ref = residual_block2d_reference(x, params)
    assert out.shape == (B, Cin, H, W)
    assert jnp.allclose(out, ref, atol=1e-5, rtol=1e-5), "mismatch vs reference"

    print("KERNEL_OK")
</pallas_src>

<mosaic_0001>
module attributes {stable_mosaic.version = 11 : i64} {
  func.func @kernel(%arg0: i32, %arg1: i32, %arg2: memref<1x4x256xf32, #tpu.memory_space<vmem>>, %arg3: memref<32x8xf32, #tpu.memory_space<vmem>>, %arg4: memref<32x1xf32, #tpu.memory_space<vmem>>, %arg5: memref<8x32xf32, #tpu.memory_space<vmem>>, %arg6: memref<8x1xf32, #tpu.memory_space<vmem>>, %arg7: memref<8x32xf32, #tpu.memory_space<vmem>>, %arg8: memref<8x1xf32, #tpu.memory_space<vmem>>, %arg9: memref<1x4x256xf32, #tpu.memory_space<vmem>>, %arg10: memref<8x256xf32, #tpu.memory_space<vmem>>) attributes {dimension_semantics = [#tpu.dimension_semantics<parallel>, #tpu.dimension_semantics<parallel>], iteration_bounds = array<i64: 2, 1>, scalar_prefetch = 0 : i64, scratch_operands = 1 : i64, tpu.core_type = #tpu.core_type<tc>, window_params = [{transform_indices = @transform_0, window_bounds = array<i64: 1, 4, 256>}, {pipeline_mode = #tpu.pipeline_mode<synchronous>, transform_indices = @transform_1, window_bounds = array<i64: 32, 8>}, {pipeline_mode = #tpu.pipeline_mode<synchronous>, transform_indices = @transform_2, window_bounds = array<i64: 32, 1>}, {pipeline_mode = #tpu.pipeline_mode<synchronous>, transform_indices = @transform_3, window_bounds = array<i64: 8, 32>}, {pipeline_mode = #tpu.pipeline_mode<synchronous>, transform_indices = @transform_4, window_bounds = array<i64: 8, 1>}, {pipeline_mode = #tpu.pipeline_mode<synchronous>, transform_indices = @transform_5, window_bounds = array<i64: 8, 32>}, {pipeline_mode = #tpu.pipeline_mode<synchronous>, transform_indices = @transform_6, window_bounds = array<i64: 8, 1>}, {transform_indices = @transform_7, window_bounds = array<i64: 1, 4, 256>}]} {
    %c0 = arith.constant 0 : index
    %c0_0 = arith.constant 0 : index
    %c0_1 = arith.constant 0 : index
    %0 = vector.load %arg2[%c0, %c0_0, %c0_1] : memref<1x4x256xf32, #tpu.memory_space<vmem>>, vector<1x4x256xf32>
    %1 = vector.shape_cast %0 : vector<1x4x256xf32> to vector<4x256xf32>
    %cst = arith.constant 0.000000e+00 : f32
    %2 = vector.broadcast %cst : f32 to vector<8x256xf32>
    %c0_2 = arith.constant 0 : index
    %c0_3 = arith.constant 0 : index
    %3 = vector.load %arg10[%c0_2, %c0_3] : memref<8x256xf32, #tpu.memory_space<vmem>>, vector<8x256xf32>
    tpu.vector_store %arg10[%c0_2, %c0_3], %2 {strides = array<i32>} : memref<8x256xf32, #tpu.memory_space<vmem>>, vector<8x256xf32>,
    %c0_4 = arith.constant 0 : index
    %c0_5 = arith.constant 0 : index
    %4 = vector.load %arg10[%c0_4, %c0_5] : memref<8x256xf32, #tpu.memory_space<vmem>>, vector<4x256xf32>
    tpu.vector_store %arg10[%c0_4, %c0_5], %1 {strides = array<i32>} : memref<8x256xf32, #tpu.memory_space<vmem>>, vector<4x256xf32>,
    %c0_6 = arith.constant 0 : index
    %c0_7 = arith.constant 0 : index
    %5 = vector.load %arg10[%c0_6, %c0_7] : memref<8x256xf32, #tpu.memory_space<vmem>>, vector<8x256xf32>
    %cst_8 = arith.constant 0.000000e+00 : f32
    %6 = vector.broadcast %cst_8 : f32 to vector<8x256xf32>
    %7 = arith.cmpf ogt, %5, %6 : vector<8x256xf32>
    %cst_9 = arith.constant 0.000000e+00 : f32
    %8 = vector.broadcast %cst_9 : f32 to vector<8x256xf32>
    %9 = arith.minimumf %5, %8 : vector<8x256xf32>
    %10 = math.exp %9 : vector<8x256xf32>
    %cst_10 = arith.constant 1.000000e+00 : f32
    %11 = vector.broadcast %cst_10 : f32 to vector<8x256xf32>
    %12 = arith.subf %10, %11 : vector<8x256xf32>
    %13 = arith.select %7, %5, %12 : vector<8x256xi1>, vector<8x256xf32>
    %c0_11 = arith.constant 0 : index
    %c0_12 = arith.constant 0 : index
    %14 = vector.load %arg3[%c0_11, %c0_12] : memref<32x8xf32, #tpu.memory_space<vmem>>, vector<32x8xf32>
    %cst_13 = arith.constant dense<0.000000e+00> : vector<32x256xf32>
    %15 = tpu.matmul %14, %13, %cst_13 {dimension_numbers = #tpu.dot_dimension_numbers<[1], [0], [0], [1], [0, 0, 1, 1], [], []>} : vector<32x8xf32>, vector<8x256xf32>, vector<32x256xf32> -> vector<32x256xf32>
    %c0_14 = arith.constant 0 : index
    %c0_15 = arith.constant 0 : index
    %16 = vector.load %arg4[%c0_14, %c0_15] : memref<32x1xf32, #tpu.memory_space<vmem>>, vector<32x1xf32>
    %17 = vector.broadcast %16 : vector<32x1xf32> to vector<32x256xf32>
    %18 = arith.addf %15, %17 : vector<32x256xf32>
    %cst_16 = arith.constant 0.000000e+00 : f32
    %19 = vector.broadcast %cst_16 : f32 to vector<32x256xf32>
    %20 = arith.cmpf ogt, %18, %19 : vector<32x256xf32>
    %cst_17 = arith.constant 0.000000e+00 : f32
    %21 = vector.broadcast %cst_17 : f32 to vector<32x256xf32>
    %22 = arith.minimumf %18, %21 : vector<32x256xf32>
    %23 = math.exp %22 : vector<32x256xf32>
    %cst_18 = arith.constant 1.000000e+00 : f32
    %24 = vector.broadcast %cst_18 : f32 to vector<32x256xf32>
    %25 = arith.subf %23, %24 : vector<32x256xf32>
    %26 = arith.select %20, %18, %25 : vector<32x256xi1>, vector<32x256xf32>
    %c0_19 = arith.constant 0 : index
    %c0_20 = arith.constant 0 : index
    %27 = vector.load %arg5[%c0_19, %c0_20] : memref<8x32xf32, #tpu.memory_space<vmem>>, vector<8x32xf32>
    %cst_21 = arith.constant dense<0.000000e+00> : vector<8x256xf32>
    %28 = tpu.matmul %27, %26, %cst_21 {dimension_numbers = #tpu.dot_dimension_numbers<[1], [0], [0], [1], [0, 0, 1, 1], [], []>} : vector<8x32xf32>, vector<32x256xf32>, vector<8x256xf32> -> vector<8x256xf32>
    %c0_22 = arith.constant 0 : index
    %c0_23 = arith.constant 0 : index
    %29 = vector.load %arg6[%c0_22, %c0_23] : memref<8x1xf32, #tpu.memory_space<vmem>>, vector<8x1xf32>
    %30 = vector.broadcast %29 : vector<8x1xf32> to vector<8x256xf32>
    %31 = arith.addf %28, %30 : vector<8x256xf32>
    %c0_24 = arith.constant 0 : index
    %c0_25 = arith.constant 0 : index
    %32 = vector.load %arg7[%c0_24, %c0_25] : memref<8x32xf32, #tpu.memory_space<vmem>>, vector<8x32xf32>
    %cst_26 = arith.constant dense<0.000000e+00> : vector<8x256xf32>
    %33 = tpu.matmul %32, %26, %cst_26 {dimension_numbers = #tpu.dot_dimension_numbers<[1], [0], [0], [1], [0, 0, 1, 1], [], []>} : vector<8x32xf32>, vector<32x256xf32>, vector<8x256xf32> -> vector<8x256xf32>
    %c0_27 = arith.constant 0 : index
    %c0_28 = arith.constant 0 : index
    %34 = vector.load %arg8[%c0_27, %c0_28] : memref<8x1xf32, #tpu.memory_space<vmem>>, vector<8x1xf32>
    %35 = vector.broadcast %34 : vector<8x1xf32> to vector<8x256xf32>
    %36 = arith.addf %33, %35 : vector<8x256xf32>
    %37 = vector.extract_strided_slice %31 {offsets = [0, 0], sizes = [4, 256], strides = [1, 1]} : vector<8x256xf32> to vector<4x256xf32>
    %38 = vector.extract_strided_slice %36 {offsets = [0, 0], sizes = [4, 256], strides = [1, 1]} : vector<8x256xf32> to vector<4x256xf32>
    %39 = arith.negf %38 : vector<4x256xf32>
    %40 = math.exp %39 : vector<4x256xf32>
    %cst_29 = arith.constant 1.000000e+00 : f32
    %41 = vector.broadcast %cst_29 : f32 to vector<4x256xf32>
    %42 = arith.addf %41, %40 : vector<4x256xf32>
    %43 = arith.divf %41, %42 : vector<4x256xf32>
    %44 = arith.mulf %37, %43 : vector<4x256xf32>
    %45 = arith.addf %44, %1 : vector<4x256xf32>
    %c0_30 = arith.constant 0 : index
    %c0_31 = arith.constant 0 : index
    %c0_32 = arith.constant 0 : index
    %46 = vector.load %arg9[%c0_30, %c0_31, %c0_32] : memref<1x4x256xf32, #tpu.memory_space<vmem>>, vector<1x4x256xf32>
    %47 = vector.shape_cast %46 : vector<1x4x256xf32> to vector<4x256xf32>
    %48 = vector.shape_cast %45 : vector<4x256xf32> to vector<1x4x256xf32>
    tpu.vector_store %arg9[%c0_30, %c0_31, %c0_32], %48 {strides = array<i32>} : memref<1x4x256xf32, #tpu.memory_space<vmem>>, vector<1x4x256xf32>,
    return
  }
  func.func @transform_0(%arg0: i32, %arg1: i32) -> (i32, i32, i32) {
    %c0_i32 = arith.constant 0 : i32
    %c0_i32_0 = arith.constant 0 : i32
    return %arg0, %c0_i32, %arg1 : i32, i32, i32
  }
  func.func @transform_1(%arg0: i32, %arg1: i32) -> (i32, i32) {
    %c0_i32 = arith.constant 0 : i32
    %c0_i32_0 = arith.constant 0 : i32
    %c0_i32_1 = arith.constant 0 : i32
    return %c0_i32, %c0_i32_0 : i32, i32
  }
  func.func @transform_2(%arg0: i32, %arg1: i32) -> (i32, i32) {
    %c0_i32 = arith.constant 0 : i32
    %c0_i32_0 = arith.constant 0 : i32
    %c0_i32_1 = arith.constant 0 : i32
    return %c0_i32, %c0_i32_0 : i32, i32
  }
  func.func @transform_3(%arg0: i32, %arg1: i32) -> (i32, i32) {
    %c0_i32 = arith.constant 0 : i32
    %c0_i32_0 = arith.constant 0 : i32
    %c0_i32_1 = arith.constant 0 : i32
    return %c0_i32, %c0_i32_0 : i32, i32
  }
  func.func @transform_4(%arg0: i32, %arg1: i32) -> (i32, i32) {
    %c0_i32 = arith.constant 0 : i32
    %c0_i32_0 = arith.constant 0 : i32
    %c0_i32_1 = arith.constant 0 : i32
    return %c0_i32, %c0_i32_0 : i32, i32
  }
  func.func @transform_5(%arg0: i32, %arg1: i32) -> (i32, i32) {
    %c0_i32 = arith.constant 0 : i32
    %c0_i32_0 = arith.constant 0 : i32
    %c0_i32_1 = arith.constant 0 : i32
    return %c0_i32, %c0_i32_0 : i32, i32
  }
  func.func @transform_6(%arg0: i32, %arg1: i32) -> (i32, i32) {
    %c0_i32 = arith.constant 0 : i32
    %c0_i32_0 = arith.constant 0 : i32
    %c0_i32_1 = arith.constant 0 : i32
    return %c0_i32, %c0_i32_0 : i32, i32
  }
  func.func @transform_7(%arg0: i32, %arg1: i32) -> (i32, i32, i32) {
    %c0_i32 = arith.constant 0 : i32
    %c0_i32_0 = arith.constant 0 : i32
    return %arg0, %c0_i32, %arg1 : i32, i32, i32
  }
}

</mosaic_0001>

<bundles_post_ra>
// kernel: tpu_custom_call.1
= control target key start
LH: loop header
LB: loop body
LE: loop exit
PB: predicated region body
PF: predicated region fallthrough
CT: control target
= control target key end

     0   :  { %12 = vsyncpa [#allocation4], 0  ;;  %s1211_s0 = inlined_call_operand.vmem [shape: f32[2,4,256], index: 0, kind: input, shape index: {}]   ;;  %s1212_s1 = inlined_call_operand.vmem [shape: f32[32,8], index: 1, kind: input, shape index: {}]   ;;  %s1213_s2 = inlined_call_operand.vmem [shape: f32[32,1], index: 2, kind: input, shape index: {}]   ;;  %s1214_s3 = inlined_call_operand.vmem [shape: f32[8,32], index: 3, kind: input, shape index: {}]   ;;  %s1215_s4 = inlined_call_operand.vmem [shape: f32[8,1], index: 4, kind: input, shape index: {}]   ;;  %s1216_s5 = inlined_call_operand.vmem [shape: f32[8,32], index: 5, kind: input, shape index: {}]   ;;  %s1217_s6 = inlined_call_operand.vmem [shape: f32[8,1], index: 6, kind: input, shape index: {}]   ;;  %s1218_s7 = inlined_call_operand.hbm [shape: f32[2,4,256], index: 7, kind: output, shape index: {}]  }
   0x1   :  { %14 = vsyncpa [#allocation4 + $0x1], 0  ;;  %s1045_s24 = smov 0   ;;  %s1047_s25 = smov 0  }
   0x2   :  { %s1049_s26 = smov 0   ;;  %s1051_s27 = smov 0  }
   0x3   :  { %s1053_s28 = smov 0   ;;  %s1055_s29 = smov 0  }
   0x4 LB: > { %s785_s30 = sadd.s32 4294967295, %s1000_s29   ;;  %s786_s8 = sadd.s32 4294967294, %s1000_s29   ;;  %s1000_s29 = sphi %s1055_s29, %s20_s29   ;;  %s996_s28 = sphi %s1053_s28, %s1225_s28   ;;  %s992_s27 = sphi %s1051_s27, %s1224_s27   ;;  %s988_s26 = sphi %s1049_s26, %s1223_s26   ;;  %s984_s25 = sphi %s1047_s25, %s1222_s25   ;;  %s980_s24 = sphi %s1045_s24, %s1221_s24  }
   0x5   : > { %s32_s9 = sadd.s32 1, %s996_s28  ;;  %s195_s10 = sadd.s32 1, %s988_s26 }
   0x6   : > { %p34_p0 = scmp.ge.s32.totalorder %s32_s9, 2  ;;  %p205_p1 = scmp.ne.s32.totalorder %s988_s26, %s984_s25 }
   0x7   : > { %p206_p2 = scmp.eq.s32.totalorder %s785_s30, 1  ;;  %p211_p3 = scmp.ne.s32.totalorder %s984_s25, %s980_s24 }
   0x8   : > { %s1227_s9 = smov (%p34_p0, %s32_s9), 0  ;;  %p212_p5 = scmp.eq.s32.totalorder %s786_s8, 1 }
   0x9   : > { %p1085_p4 = por %p206_p2, %p205_p1  ;;  %s190_s12 = ssub.s32 %s996_s28, %s1227_s9 }
   0xa   : > { %p789_p6 = scmp.ge.s32.totalorder %s1000_s29, 1  ;;  %p193_p7 = scmp.eq.s32.totalorder %s190_s12, 0 }
   0xb   : > { %p1092_p8 = por %p212_p5, %p211_p3  ;;  %p261_p9 = scmp.lt.s32.totalorder %s1000_s29, 3 }
   0xc   : > { %s1098_s14 = scalar_select %p193_p7, %s988_s26, %s195_s10  }
   0xd   : > { %p262_p10 = pnand %p789_p6, %p261_p9 }
   0xe   : > { %p298_p11 = scmp.lt.s32.totalorder (!%p262_p10), %s992_s27, 1  ;;  %v1002_v0 = vmov (!%p262_p10), 0.0   ;;  %v334_v1 = vld [vmem:[%s1213_s2] sm:$0xff] (!%p262_p10)  ;;  %v336_v2 = vld [vmem:[%s1213_s2 + $0x10] sm:$0xff] (!%p262_p10)  ;;  %v1003_v3 = vmov (!%p262_p10), 0   ;;  %v335_v4 = vld [vmem:[%s1213_s2 + $0x8] sm:$0xff] (!%p262_p10) }
   0xf   : > { %265 = sbr.rel (%p262_p10) target bundleno = 577 (0x241), region = 48  ;;  %310 = vst [vmem:[#allocation2 + $0x8] sm:$0xff] (!%p262_p10), %v1002_v0  ;;  %309 = vst [vmem:[#allocation2] sm:$0xff] (!%p262_p10), %v1002_v0  ;;  %435 = vmatprep.mubr.f32.mxu0 (!%p262_p10), %v1002_v0  ;;  %583 = vmatprep.mubr.f32.mxu1 (!%p262_p10), %v1002_v0  ;;  %v337_v5 = vld [vmem:[%s1213_s2 + $0x18] sm:$0xff] (!%p262_p10)  ;;  %v591_v8 = vld [vmem:[%s1217_s6] sm:$0xff] (!%p262_p10)  ;;  %vm358_vm2 = vcmask (!%p262_p10), 64512  }
  0x10   : > { %891 = vset.pattern.permute.xlu0 (!%p262_p10), %v1003_v3  ;;  %892 = vset.pattern.permute.xlu1 (!%p262_p10), %v1003_v3  ;;  %v509_v9 = vld [vmem:[%s1215_s4] sm:$0xff] (!%p262_p10)  ;;  %v331_v23 = vld [vmem:[%s1212_s1 + $0x8] sm:$0xff] (!%p262_p10)  ;;  %v332_v24 = vld [vmem:[%s1212_s1 + $0x10] sm:$0xff] (!%p262_p10)  ;;  %vm515_vm11 = vcmask (!%p262_p10), 261120   ;;  %s294_s18 = sand.u32 (!%p262_p10), 1, %s984_s25  }
  0x11   : > { %340 = vperm.xlu0 (!%p262_p10), %891, %v334_v1   ;;  %350 = vperm.xlu1 (!%p262_p10), %892, %v336_v2   ;;  %v330_v22 = vld [vmem:[%s1212_s1] sm:$0xff] (!%p262_p10)  ;;  %v333_v25 = vld [vmem:[%s1212_s1 + $0x18] sm:$0xff] (!%p262_p10)  ;;  %s693_s10 = scalar_lea.sflag (!%p262_p10), [#allocation4], %s294_s18 }
  0x15   : > { %345 = vperm.xlu0 (!%p262_p10), %891, %v335_v4   ;;  %355 = vperm.xlu1 (!%p262_p10), %892, %v337_v5  }
  0x16   : > { %s299_s19 = scalar_select %p298_p11, %s992_s27, 1 }
  0x18   : > { %s816_s20 = sshll.u32 %s299_s19, 3  ;;  %s790_s19 = sshll.u32 %s294_s18, 3 }
  0x19   : > { %s305_s12 = scalar_lea.vmem %s1211_s0, %s816_s20  ;;  %594 = vperm.xlu0 %891, %v591_v8   ;;  %512 = vperm.xlu1 %892, %v509_v9   ;;  %s817_s20 = sshll.u32 %s992_s27, 7 }
  0x1a   : > { %v1121_v6 = vld [vmem:[%s305_s12] sm:$0xff]  ;;  %s296_s21 = scalar_lea.vmem [#allocation3], %s790_s19  ;;  %s1164_s8 = scalar_lea.hbm %s1218_s7, %s817_s20 }
  0x1b   : > { %v1125_v7 = vcombine.high %v1121_v6, %v1121_v6  ;;  %314 = vst [vmem:[#allocation2] sm:$0xf] %v1121_v6  ;;  %s709_s22 = sshll.u32 %s296_s21, 4  ;;  %s1004_s27 = smov [#allocation3]   ;;  %s1166_s22 = int_to_ptr.vmem [resolvable:$true] %s709_s22 }
  0x1c   : > { %s922_s12 = scalar_lea.vmem %s1166_s22, 128  ;;  %s926_s15 = sshll.u32 %s1004_s27, 4  ;;  %s927_s15 = int_to_ptr.vmem [resolvable:$false] %s926_s15 }
  0x1d   : > { %315 = vst [vmem:[#allocation2 + $0x8] sm:$0xf] %v1125_v7  ;;  %p923_p12 = scmp.ne.s32.totalorder %s1166_s22, %s922_s12  ;;  %s928_s16 = scalar_lea.vmem %s927_s15, 256 }
  0x1e   : > { %p929_p1 = scmp.lt.s32.totalorder %s1166_s22, %s927_s15  ;;  %p930_p2 = scmp.lt.s32.totalorder %s928_s16, %s922_s12 }
  0x1f   : > { %p924_p13 = pnand %p923_p12, %p1085_p4 }
  0x20   : > { %p931_p3 = por %p930_p2, %p929_p1 }
  0x21   : > { %p925_p0 = pneg %p924_p13 }
  0x22   : > { %v316_v10 = vld [vmem:[#allocation2] sm:$0xff] }
  0x23   : > { %v320_v11 = vmin.f32 %v316_v10, 0.0  ;;  %vm318_vm0 = vcmp.gt.f32.partialorder %v316_v10, 0.0  ;;  %p932_p5 = pnand %p931_p3, %p925_p0 }
  0x24   : > { %v317_v12 = vld [vmem:[#allocation2 + $0x8] sm:$0xff] }
  0x25   : > { %v321_v13 = vmin.f32 %v317_v12, 0.0  ;;  %v322_v14 = vmul.f32 1.442695, %v320_v11  ;;  %vm319_vm1 = vcmp.gt.f32.partialorder %v317_v12, 0.0 }
  0x27   : > { %v324_v15 = vmul.f32 1.442695, %v321_v13  ;;  %894 = vpow2.f32 %v322_v14 }
  0x29   : > { %896 = vpow2.f32 %v324_v15 }
  0x31   : > { %v895_v16 = vpop.eup %894 }
  0x32   : > { %v793_v17 = vadd.f32 -1.0, %v895_v16 }
  0x33   : > { %v897_v18 = vpop.eup %896 }
  0x34   : > { %v794_v19 = vadd.f32 -1.0, %v897_v18  ;;  %v328_v20 = vsel %vm318_vm0, %v316_v10, %v793_v17 }
  0x36   : > { %v329_v21 = vsel %vm319_vm1, %v317_v12, %v794_v19 }
  0x37   : > { %371 = vmatprep.subr.mxu0 %v329_v21 }
  0x38   : > { %372 = vmatpush1.msra.mxu0 %v328_v20 }
  0x39   : > { %795 = vmatmul.mubr.msk.f32.vlgmr.msra.gmra.mrb[0].mxu0 %vm358_vm2, %v330_v22 }
  0x3a   : > { %441 = vmatprep.mubr.f32.mxu0 %v1002_v0 }
  0x3d   : > { %796 = vmatmul.mubr.msk.f32.gmra.mrb[2].mxu0 %vm358_vm2, %v331_v23 }
  0x3e   : > { %447 = vmatprep.mubr.f32.mxu0 %v1002_v0 }
  0x41   : > { %797 = vmatmul.mubr.msk.f32.gmra.mrb[4].mxu0 %vm358_vm2, %v332_v24 }
  0x42   : > { %453 = vmatprep.mubr.f32.mxu0 %v1002_v0 }
  0x45   : > { %798 = vmatmul.mubr.msk.f32.gmra.mrb[6].mxu0 %vm358_vm2, %v333_v25 }
  0x90   : > { %v341_v26 = vpop.permute.xlu0 %340  ;;  %v351_v38 = vpop.permute.xlu1 %350 }
  0x94   : > { %v346_v32 = vpop.permute.xlu0 %345  ;;  %v356_v50 = vpop.permute.xlu1 %355 }
 0x10c   : > { %v437_v27 = vpop.f32.mrb[0].mxu0 }
 0x10d   : > { %v438_v28 = vadd.f32 %v437_v27, %v341_v26  ;;  %v439_v29 = vpop.f32.mrb[1].mxu0 }
 0x10e   : > { %v440_v30 = vadd.f32 %v439_v29, %v341_v26  ;;  %v508_v29 = vld [vmem:[%s1214_s3] sm:$0xff] }
 0x10f   : > { %v468_v31 = vmin.f32 %v438_v28, 0.0  ;;  %vm460_vm3 = vcmp.gt.f32.partialorder %v438_v28, 0.0 }
 0x110   : > { %v469_v33 = vmin.f32 %v440_v30, 0.0  ;;  %v443_v34 = vpop.f32.mrb[2].mxu0  ;;  %vm461_vm5 = vcmp.gt.f32.partialorder %v440_v30, 0.0 }
 0x111   : > { %v476_v35 = vmul.f32 1.442695, %v468_v31  ;;  %v444_v36 = vadd.f32 %v443_v34, %v346_v32  ;;  %v445_v37 = vpop.f32.mrb[3].mxu0 }
 0x112   : > { %v478_v39 = vmul.f32 1.442695, %v469_v33  ;;  %v446_v40 = vadd.f32 %v445_v37, %v346_v32  ;;  %v595_v33 = vpop.permute.xlu0 %594 }
 0x113   : > { %898 = vpow2.f32 %v476_v35  ;;  %v470_v41 = vmin.f32 %v444_v36, 0.0  ;;  %vm462_vm4 = vcmp.gt.f32.partialorder %v444_v36, 0.0 }
 0x114   : > { %900 = vpow2.f32 %v478_v39  ;;  %v471_v42 = vmin.f32 %v446_v40, 0.0  ;;  %v449_v43 = vpop.f32.mrb[4].mxu0  ;;  %vm463_vm6 = vcmp.gt.f32.partialorder %v446_v40, 0.0 }
 0x115   : > { %v480_v44 = vmul.f32 1.442695, %v470_v41  ;;  %v450_v45 = vadd.f32 %v449_v43, %v351_v38  ;;  %v451_v46 = vpop.f32.mrb[5].mxu0  ;;  %v513_v43 = vpop.permute.xlu1 %512 }
 0x116   : > { %v482_v47 = vmul.f32 1.442695, %v471_v42  ;;  %v452_v48 = vadd.f32 %v451_v46, %v351_v38 }
 0x117   : > { %902 = vpow2.f32 %v480_v44  ;;  %v472_v49 = vmin.f32 %v450_v45, 0.0  ;;  %vm464_vm7 = vcmp.gt.f32.partialorder %v450_v45, 0.0 }
 0x118   : > { %904 = vpow2.f32 %v482_v47  ;;  %v473_v51 = vmin.f32 %v452_v48, 0.0  ;;  %v455_v52 = vpop.f32.mrb[6].mxu0  ;;  %vm465_vm9 = vcmp.gt.f32.partialorder %v452_v48, 0.0 }
 0x119   : > { %v484_v53 = vmul.f32 1.442695, %v472_v49  ;;  %v456_v54 = vadd.f32 %v455_v52, %v356_v50  ;;  %v457_v55 = vpop.f32.mrb[7].mxu0 }
 0x11a   : > { %v486_v56 = vmul.f32 1.442695, %v473_v51  ;;  %v458_v57 = vadd.f32 %v457_v55, %v356_v50 }
 0x11b   : > { %906 = vpow2.f32 %v484_v53  ;;  %v474_v58 = vmin.f32 %v456_v54, 0.0  ;;  %vm466_vm8 = vcmp.gt.f32.partialorder %v456_v54, 0.0 }
 0x11c   : > { %908 = vpow2.f32 %v486_v56  ;;  %v475_v59 = vmin.f32 %v458_v57, 0.0  ;;  %vm467_vm10 = vcmp.gt.f32.partialorder %v458_v57, 0.0 }
 0x11d   : > { %v899_v60 = vpop.eup %898  ;;  %v488_v61 = vmul.f32 1.442695, %v474_v58 }
 0x11e   : > { %v901_v62 = vpop.eup %900  ;;  %v490_v63 = vmul.f32 1.442695, %v475_v59  ;;  %v799_v1 = vadd.f32 -1.0, %v899_v60 }
 0x11f   : > { %910 = vpow2.f32 %v488_v61  ;;  %v800_v3 = vadd.f32 -1.0, %v901_v62 }
 0x120   : > { %912 = vpow2.f32 %v490_v63  ;;  %v500_v9 = vsel %vm460_vm3, %v438_v28, %v799_v1 }
 0x121   : > { %v903_v2 = vpop.eup %902  ;;  %v501_v12 = vsel %vm461_vm5, %v440_v30, %v800_v3  ;;  %v590_v30 = vld [vmem:[%s1216_s5] sm:$0xff] }
 0x122   : > { %v905_v4 = vpop.eup %904  ;;  %v801_v5 = vadd.f32 -1.0, %v903_v2 }
 0x123   : > { %v802_v8 = vadd.f32 -1.0, %v905_v4 }
 0x124   : > { %v502_v10 = vsel %vm462_vm4, %v444_v36, %v801_v5 }
 0x125   : > { %v907_v11 = vpop.eup %906  ;;  %v503_v13 = vsel %vm463_vm6, %v446_v40, %v802_v8  ;;  %v820_v14 = vpack.c.bf16 %v502_v10, %v500_v9 }
 0x126   : > { %v909_v15 = vpop.eup %908  ;;  %v818_v16 = vpack.c.bf16 %v503_v13, %v501_v12  ;;  %v803_v17 = vadd.f32 -1.0, %v907_v11 }
 0x127   : > { %v804_v19 = vadd.f32 -1.0, %v909_v15 }
 0x128   : > { %819 = vmatprep.subr.bf16.mxu1 %v818_v16  ;;  %v504_v23 = vsel %vm464_vm7, %v450_v45, %v803_v17 }
 0x129   : > { %v911_v18 = vpop.eup %910  ;;  %821 = vmatpush1.bf16.msra.mxu1 %v820_v14  ;;  %v505_v25 = vsel %vm465_vm9, %v452_v48, %v804_v19 }
 0x12a   : > { %v913_v20 = vpop.eup %912  ;;  %v805_v21 = vadd.f32 -1.0, %v911_v18 }
 0x12b   : > { %v806_v22 = vadd.f32 -1.0, %v913_v20 }
 0x12c   : > { %v506_v24 = vsel %vm466_vm8, %v456_v54, %v805_v21 }
 0x12d   : > { %v507_v26 = vsel %vm467_vm10, %v458_v57, %v806_v22  ;;  %v824_v27 = vpack.c.bf16 %v506_v24, %v504_v23 }
 0x12e   : > { %v822_v28 = vpack.c.bf16 %v507_v26, %v505_v25 }
 0x130   : > { %823 = vmatprep.subr.bf16.mxu1 %v822_v28 }
 0x131   : > { %825 = vmatpush1.bf16.msra.mxu1 %v824_v27 }
 0x132   : > { %827 = vmatprep.subr.bf16.mxu1 %v818_v16 }
 0x134   : > { %807 = vmatmul.mubr.msk.f32.vlgmr.msra.gmra.mrb[0].mxu1 %vm515_vm11, %v508_v29 }
 0x135   : > { %829 = vmatpush1.bf16.msra.mxu1 %v820_v14  ;;  %664 = vmatprep.mubr.f32.mxu1 %v1002_v0 }
 0x136   : > { %831 = vmatprep.subr.bf16.mxu1 %v822_v28 }
 0x139   : > { %833 = vmatpush1.bf16.msra.mxu1 %v824_v27 }
 0x13c   : > { %808 = vmatmul.mubr.msk.f32.vlgmr.msra.gmra.mrb[2].mxu1 %vm515_vm11, %v590_v30 }
 0x207   : > { %v585_v31 = vpop.f32.mrb[0].mxu1 }
 0x208   : > { %v587_v32 = vpop.f32.mrb[1].mxu1  ;;  %v586_v44 = vadd.f32 %v585_v31, %v513_v43 }
 0x209   : > { %v588_v46 = vadd.f32 %v587_v32, %v513_v43 }
 0x20f   : > { %v666_v34 = vpop.f32.mrb[2].mxu1 }
 0x210   : > { %v667_v35 = vadd.f32 %v666_v34, %v595_v33  ;;  %v668_v36 = vpop.f32.mrb[3].mxu1 }
 0x211   : > { %v669_v37 = vadd.f32 %v668_v36, %v595_v33 }
 0x212   : > { %v809_v38 = vmul.f32 -1.442695, %v667_v35 }
 0x213   : > { %v810_v39 = vmul.f32 -1.442695, %v669_v37 }
 0x214   : > { %914 = vpow2.f32 %v809_v38 }
 0x215   : > { %916 = vpow2.f32 %v810_v39 }
 0x21e   : > { %v915_v0 = vpop.eup %914 }
 0x21f   : > { %v917_v40 = vpop.eup %916  ;;  %v677_v41 = vadd.f32 1.0, %v915_v0 }
 0x220   : > { %v678_v42 = vadd.f32 1.0, %v917_v40 }
 0x221   : > { %918 = vrcp.f32 %v677_v41 }
 0x222   : > { %920 = vrcp.f32 %v678_v42 }
 0x22b   : > { %v919_v45 = vpop.eup %918 }
 0x22c   : > { %v921_v47 = vpop.eup %920  ;;  %v683_v48 = vmul.f32 %v919_v45, %v586_v44 }
 0x22d   : > { %v684_v49 = vmul.f32 %v921_v47, %v588_v46 }
 0x22e   : > { %v685_v50 = vadd.f32 %v683_v48, %v1121_v6 }
 0x22f   : > { %v686_v51 = vadd.f32 %v684_v49, %v1125_v7 }
 0x231   : > { %v689_v52 = vcombine.low %v685_v50, %v686_v51 }
 0x233   : > { %691 = vst [vmem:[%s296_s21] sm:$0xff] %v689_v52 }
 0x234   : > { %935 = shalt.err (!%p932_p5)
}
 0x235   : > { %s936_s17 = scalar_lea.hbm %s1164_s8, 128  ;;  %s940_s20 = scalar_lea.hbm %s1218_s7, 256 }
 0x236   : > { %p937_p6 = scmp.ne.s32.totalorder %s1164_s8, %s936_s17  ;;  %p941_p10 = scmp.lt.u32.totalorder %s1164_s8, %s1218_s7 }
 0x237   : > { %p942_p11 = scmp.lt.u32.totalorder %s940_s20, %s936_s17  ;;  %p944_p13 = scmp.lt.u32.totalorder %s936_s17, %s1164_s8 }
 0x238   : > { %p938_p7 = pnand %p937_p6, %p1085_p4 }
 0x239   : > { %p943_p12 = por %p942_p11, %p941_p10 }
 0x23a   : > { %p939_p9 = pneg %p938_p7 }
 0x23b   : > { %p945_p0 = por %p944_p13, %p943_p12 }
 0x23d   : > { %p946_p1 = pnand %p945_p0, %p939_p9 }
 0x23f   : > { %949 = shalt.err (!%p946_p1)
}
 0x240   : > { %834 = dma.vmem_to_hbm [thread:$0]  (%p1085_p4), %s1166_s22, 128, %s1164_s8, %s693_s10  }
 0x241 PF: > { %p840_p2 = scmp.ge.s32.totalorder %s1000_s29, 2  ;;  %s721_s30 = sand.u32 1, %s980_s24  }
 0x242   : > { %s722_s12 = scalar_lea.sflag [#allocation4], %s721_s30 }
 0x243   : > { %p837_p3 = pnand %p840_p2, %p1092_p8 }
 0x245   : > { %975 = dma.done.wait (!%p837_p3), %s722_s12, 128  }
 0x246   : > { %977 = vsyncadd (!%p837_p3), %s722_s12, 4294967168  ;;  %s20_s29 = sadd.s32 1, %s1000_s29   ;;  %s1221_s24 = smov %s984_s25 }
 0x247   : > { %p17_p5 = scmp.ge.s32.totalorder %s20_s29, 4   ;;  %s1222_s25 = smov %s988_s26 }
 0x248   : > { %s1223_s26 = smov %s1098_s14  ;;  %s1224_s27 = smov %s996_s28 }
 0x249   : > { %s1225_s28 = smov %s1227_s9  ;;  %19 = sbr.rel (!%p17_p5) target bundleno = 4 (0x4), region = 83 }
 0x250   :  { %727 = vsyncpa [#allocation4], 1 }
 0x251   :  { %729 = vsyncpa [#allocation4 + $0x1], 1 }

</bundles_post_ra>
